<compile_context>
chip_gen: v7x
topology: tpu7x:2x2x1
jax: 0.10.0
libtpu: 0.0.40
codegen_flags: <defaults>
</compile_context>

<pallas_src>
import jax
import jax.numpy as jnp
from jax.experimental import pallas as pl
from jax.experimental.pallas import tpu as pltpu


_LANE = 128


def _round_up(x, m):
    return (x + m - 1) // m * m


def _sublane_pack(dtype):
    # Sublane packing per dtype width: f32 -> 8, bf16 -> 16, int8/fp8 -> 32.
    return {4: 8, 2: 16, 1: 32}.get(jnp.dtype(dtype).itemsize, 8)


def _tpu_vmem_bytes():
    try:
        return int(pltpu.get_tpu_info().vmem_capacity_bytes)
    except Exception:
        # Unknown backend / older jax: be conservative (v7x = 64 MiB per core).
        return 64 << 20


def prepare_linear_params(w, b):
    """One-time prep of the static nn.Linear params for the Pallas kernel.

    w: (n_1, n_in) PyTorch layout -> w_t: (n_in, Np), Np = round_up(n_1, 128)
    b: (n_1,)                     -> b_p: (1, Np)
    Lane-dense zero padding of the OUTPUT dim only: stores stay full-width
    `vst`, padded columns are exact zeros and are sliced off after the call.
    """
    n_1, n_in = w.shape
    Np = _round_up(n_1, _LANE)
    w_t = jnp.zeros((n_in, Np), w.dtype).at[:, :n_1].set(w.T)
    b_p = jnp.zeros((1, Np), b.dtype).at[0, :n_1].set(b)
    return w_t, b_p


def _parallel_fc_kernel(x_ref, w_ref, b_ref, o_ref):
    # MXU matmul with f32 accumulation, bias add on the VPU in f32,
    # single downcast at the final store.
    acc = jnp.dot(x_ref[...], w_ref[...], preferred_element_type=jnp.float32)
    acc = acc + b_ref[...].astype(jnp.float32)   # (1, TN) broadcasts over rows
    o_ref[...] = acc.astype(o_ref.dtype)


def _choose_tiles(B, K, Np, x_dt, w_dt, b_dt, o_dt):
    """Generation-aware (TM, TN, vmem_limit) selection."""
    vmem_cap = _tpu_vmem_bytes()
    # v5e/v6e: 128 MiB VMEM -> big batch tiles amortize per-step overhead and
    # maximize rows computed per weight read. v7x: 64 MiB -> keep TM <= 256 so
    # the streamed tiles stay fully double-buffered without spilling.
    tm_max = 1024 if vmem_cap >= (100 << 20) else 256
    pack = _sublane_pack(x_dt)
    TM = max(pack, min(tm_max, _round_up(B, pack)))

    xi = jnp.dtype(x_dt).itemsize
    wi = jnp.dtype(w_dt).itemsize
    bi = jnp.dtype(b_dt).itemsize
    oi = jnp.dtype(o_dt).itemsize
    budget = max(vmem_cap // 3, 8 << 20)   # stay within the scoped-VMEM default

    def need(tm, tn):
        # Double-buffered streamed tiles; weight/bias counted x2 as well
        # (conservative: they are only loop-invariant when grid_n == 1).
        return 2 * (tm * K * xi + K * tn * wi + tn * bi + tm * tn * oi)

    # Prefer >=256-wide output tiles (v6e/v7x MXU is 2x256x256); 128 is v5e's
    # native width and the fallback when Np is not a 256 multiple.
    tn_candidates = [t for t in (512, 256, 128) if Np % t == 0] or [Np]
    TN = tn_candidates[-1]
    for t in tn_candidates:
        if need(TM, t) <= budget:
            TN = t
            break
    while TM > pack and need(TM, TN) > budget:
        TM = max(pack, TM // 2)

    vmem_limit = int(min(max(2 * need(TM, TN), 8 << 20), vmem_cap // 2))
    return TM, TN, vmem_limit


def parallel_fc_prepared(x, w_t, b_p, n_out):
    """y = x @ W^T + b with pre-prepared (transposed, lane-padded) params.

    x:   (B, n_in)
    w_t: (n_in, Np)  from prepare_linear_params
    b_p: (1, Np)     from prepare_linear_params
    n_out: original n_1 (columns to keep)
    """
    B, K = x.shape
    Kw, Np = w_t.shape
    assert K == Kw, "weight in_features must match x feature dim"
    assert Np % _LANE == 0 and b_p.shape == (1, Np)

    out_dtype = jnp.result_type(x.dtype, w_t.dtype)
    TM, TN, vmem_limit = _choose_tiles(B, K, Np, x.dtype, w_t.dtype,
                                       b_p.dtype, out_dtype)
    grid = (pl.cdiv(B, TM), Np // TN)

    cost = pl.CostEstimate(
        flops=2 * B * K * Np,
        transcendentals=0,
        bytes_accessed=(B * K * jnp.dtype(x.dtype).itemsize
                        + K * Np * jnp.dtype(w_t.dtype).itemsize
                        + Np * jnp.dtype(b_p.dtype).itemsize
                        + B * Np * jnp.dtype(out_dtype).itemsize),
    )

    # TODO(synk): when grid[1] == 1 the weight block is loop-invariant; a
    # pipeline_mode=pl.Buffered(1) on its BlockSpec would reclaim one weight
    # buffer of VMEM on v7x (left at the default double-buffer for safety).
    y_p = pl.pallas_call(
        _parallel_fc_kernel,
        out_shape=jax.ShapeDtypeStruct((B, Np), out_dtype),
        grid_spec=pltpu.PrefetchScalarGridSpec(
            num_scalar_prefetch=0,
            grid=grid,
            in_specs=[
                pl.BlockSpec((TM, K), lambda i, j: (i, 0)),   # batch-tiled x, K unpadded
                pl.BlockSpec((K, TN), lambda i, j: (0, j)),   # weight column tile
                pl.BlockSpec((1, TN), lambda i, j: (0, j)),   # bias column tile
            ],
            out_specs=pl.BlockSpec((TM, TN), lambda i, j: (i, j)),
        ),
        compiler_params=pltpu.CompilerParams(
            # No reduction grid axis: both axes independent -> shard across TCs.
            dimension_semantics=("parallel", "parallel"),
            vmem_limit_bytes=vmem_limit,
        ),
        cost_estimate=cost,
    )(x, w_t, b_p)

    # Strip lane padding (X.clone() in the PyTorch module is a functional no-op).
    return y_p[:, :n_out]


def parallel_fc(x, w, b, *, min_pallas_elems=1 << 14):
    """nn.Linear forward. Tiny shapes (launch/DMA-overhead bound) go to plain
    XLA; larger shapes take the Pallas kernel. For repeated calls, prefer
    prepare_linear_params() once + parallel_fc_prepared() so the padded weight
    is not rebuilt every forward."""
    B, n_in = x.shape
    n_1, n_in_w = w.shape
    assert n_in == n_in_w, "weight in_features must match x feature dim"
    if B * n_1 < min_pallas_elems:
        return x @ w.T + b
    w_t, b_p = prepare_linear_params(w, b)
    return parallel_fc_prepared(x, w_t, b_p, n_1)


if __name__ == "__main__":
    # Small shapes consistent with the module: batch=8, n_in=32, n_1=16.
    B, n_in, n_1 = 8, 32, 16

    key = jax.random.PRNGKey(0)
    kx, kw, kb = jax.random.split(key, 3)

    x = jax.random.normal(kx, (B, n_in), dtype=jnp.float32)

    # Deterministic params mimicking nn.Linear init: U(-1/sqrt(n_in), 1/sqrt(n_in)).
    bound = 1.0 / jnp.sqrt(jnp.float32(n_in))
    w = jax.random.uniform(kw, (n_1, n_in), minval=-bound, maxval=bound,
                           dtype=jnp.float32)   # PyTorch layout (out, in)
    b = jax.random.uniform(kb, (n_1,), minval=-bound, maxval=bound,
                           dtype=jnp.float32)

    # Parameter prep is done ONCE (hoisted out of the forward): static params.
    w_t, b_p = prepare_linear_params(w, b)

    # Exercise the Pallas kernel path explicitly.
    y = parallel_fc_prepared(x, w_t, b_p, n_1)
    y = jax.block_until_ready(y)

    y_ref = x @ w.T + b
    assert y.shape == (B, n_1)
    assert jnp.allclose(y, y_ref, atol=1e-5, rtol=1e-5)

    # Dispatcher: at these tiny catRSDNet shapes it falls back to plain XLA.
    y2 = jax.block_until_ready(parallel_fc(x, w, b))
    assert jnp.allclose(y2, y_ref, atol=1e-5, rtol=1e-5)

    print("KERNEL_OK")
</pallas_src>

<mosaic_0001>
module attributes {stable_mosaic.version = 11 : i64} {
  func.func @_parallel_fc_kernel(%arg0: i32, %arg1: i32, %arg2: memref<8x32xf32, #tpu.memory_space<vmem>>, %arg3: memref<32x128xf32, #tpu.memory_space<vmem>>, %arg4: memref<1x128xf32, #tpu.memory_space<vmem>>, %arg5: memref<8x128xf32, #tpu.memory_space<vmem>>) attributes {dimension_semantics = [#tpu.dimension_semantics<parallel>, #tpu.dimension_semantics<parallel>], iteration_bounds = array<i64: 1, 1>, scalar_prefetch = 0 : i64, scratch_operands = 0 : i64, tpu.core_type = #tpu.core_type<tc>, window_params = [{transform_indices = @transform_0, window_bounds = array<i64: 8, 32>}, {transform_indices = @transform_1, window_bounds = array<i64: 32, 128>}, {transform_indices = @transform_2, window_bounds = array<i64: 1, 128>}, {transform_indices = @transform_3, window_bounds = array<i64: 8, 128>}]} {
    %c0 = arith.constant 0 : index
    %c0_0 = arith.constant 0 : index
    %0 = vector.load %arg2[%c0, %c0_0] : memref<8x32xf32, #tpu.memory_space<vmem>>, vector<8x32xf32>
    %c0_1 = arith.constant 0 : index
    %c0_2 = arith.constant 0 : index
    %1 = vector.load %arg3[%c0_1, %c0_2] : memref<32x128xf32, #tpu.memory_space<vmem>>, vector<32x128xf32>
    %cst = arith.constant dense<0.000000e+00> : vector<8x128xf32>
    %2 = tpu.matmul %0, %1, %cst {dimension_numbers = #tpu.dot_dimension_numbers<[1], [0], [0], [1], [0, 0, 1, 1], [], []>} : vector<8x32xf32>, vector<32x128xf32>, vector<8x128xf32> -> vector<8x128xf32>
    %c0_3 = arith.constant 0 : index
    %c0_4 = arith.constant 0 : index
    %3 = vector.load %arg4[%c0_3, %c0_4] : memref<1x128xf32, #tpu.memory_space<vmem>>, vector<1x128xf32>
    %4 = vector.broadcast %3 : vector<1x128xf32> to vector<8x128xf32>
    %5 = arith.addf %2, %4 : vector<8x128xf32>
    %c0_5 = arith.constant 0 : index
    %c0_6 = arith.constant 0 : index
    %6 = vector.load %arg5[%c0_5, %c0_6] : memref<8x128xf32, #tpu.memory_space<vmem>>, vector<8x128xf32>
    tpu.vector_store %arg5[%c0_5, %c0_6], %5 {strides = array<i32>} : memref<8x128xf32, #tpu.memory_space<vmem>>, vector<8x128xf32>,
    return
  }
  func.func @transform_0(%arg0: i32, %arg1: i32) -> (i32, i32) {
    %c0_i32 = arith.constant 0 : i32
    %c0_i32_0 = arith.constant 0 : i32
    return %arg0, %c0_i32 : i32, i32
  }
  func.func @transform_1(%arg0: i32, %arg1: i32) -> (i32, i32) {
    %c0_i32 = arith.constant 0 : i32
    %c0_i32_0 = arith.constant 0 : i32
    return %c0_i32, %arg1 : i32, i32
  }
  func.func @transform_2(%arg0: i32, %arg1: i32) -> (i32, i32) {
    %c0_i32 = arith.constant 0 : i32
    %c0_i32_0 = arith.constant 0 : i32
    return %c0_i32, %arg1 : i32, i32
  }
  func.func @transform_3(%arg0: i32, %arg1: i32) -> (i32, i32) {
    %c0_i32 = arith.constant 0 : i32
    return %arg0, %arg1 : i32, i32
  }
}

</mosaic_0001>

<bundles_post_ra>
// kernel: tpu_custom_call.1
= control target key start
LH: loop header
LB: loop body
LE: loop exit
PB: predicated region body
PF: predicated region fallthrough
CT: control target
= control target key end

     0   :  { %8 = vsyncpa [#allocation3], 0  ;;  %s322_s0 = inlined_call_operand.hbm [shape: f32[8,32], index: 0, kind: input, shape index: {}]   ;;  %s323_s1 = inlined_call_operand.hbm [shape: f32[32,128], index: 1, kind: input, shape index: {}]   ;;  %s324_s2 = inlined_call_operand.vmem [shape: f32[1,128], index: 2, kind: input, shape index: {}]   ;;  %s325_s3 = inlined_call_operand.hbm [shape: f32[8,128], index: 3, kind: output, shape index: {}]  }
   0x1   :  { %9 = vsyncpa [#allocation6], 0 }
   0x2   :  { %10 = vsyncpa [#allocation4], 0  ;;  %s248_s12 = smov [#allocation2]   ;;  %s249_s14 = smov [#allocation5]  }
   0x3   :  { %s17_s13 = sshll.u32 %s248_s12, 4  ;;  %s26_s15 = sshll.u32 %s249_s14, 4  ;;  %s18_s13 = int_to_ptr.vmem [resolvable:$true] %s17_s13  ;;  %s276_s15 = int_to_ptr.vmem [resolvable:$true] %s26_s15 }
   0x4   :  { %s176_s18 = scalar_lea.hbm %s322_s0, 128 }
   0x5   :  { %p177_p0 = scmp.ne.s32.totalorder %s322_s0, %s176_s18  ;;  %p180_p1 = scmp.lt.u32.totalorder %s176_s18, %s322_s0 }
   0x7   :  { %p182_p2 = pnand %p180_p1, %p177_p0 }
   0x9   :  { %185 = shalt.err (!%p182_p2)
}
   0xa   :  { %s186_s23 = scalar_lea.vmem %s18_s13, 128  ;;  %p191_p4 = scmp.lt.s32.totalorder %s18_s13, %s18_s13 }
   0xb   :  { %p187_p3 = scmp.ne.s32.totalorder %s18_s13, %s186_s23  ;;  %p192_p5 = scmp.lt.s32.totalorder %s186_s23, %s186_s23 }
   0xd   :  { %p193_p6 = por %p192_p5, %p191_p4 }
   0xf   :  { %p194_p7 = pnand %p193_p6, %p187_p3 }
  0x11   :  { %197 = shalt.err (!%p194_p7)
}
  0x12   :  { %20 = dma.hbm_to_vmem [thread:$0]  %s322_s0, 128, %s18_s13, [#allocation3]  }
  0x13   :  { %s198_s28 = scalar_lea.hbm %s323_s1, 512 }
  0x14   :  { %p199_p8 = scmp.ne.s32.totalorder %s323_s1, %s198_s28  ;;  %p202_p9 = scmp.lt.u32.totalorder %s198_s28, %s323_s1 }
  0x16   :  { %p204_p10 = pnand %p202_p9, %p199_p8 }
  0x18   :  { %207 = shalt.err (!%p204_p10)
}
  0x19   :  { %s208_s6 = scalar_lea.vmem %s276_s15, 512  ;;  %p213_p12 = scmp.lt.s32.totalorder %s276_s15, %s276_s15 }
  0x1a   :  { %p209_p11 = scmp.ne.s32.totalorder %s276_s15, %s208_s6  ;;  %p214_p13 = scmp.lt.s32.totalorder %s208_s6, %s208_s6 }
  0x1c   :  { %p215_p0 = por %p214_p13, %p213_p12 }
  0x1e   :  { %p216_p1 = pnand %p215_p0, %p209_p11 }
  0x20   :  { %219 = shalt.err (!%p216_p1)
}
  0x21   :  { %s250_s0 = smov 128   ;;  %s251_s7 = smov 8  }
  0x22   :  { %32 = dma.hbm_to_vmem [thread:$0]  %s323_s1, 512, %s276_s15, [#allocation6], %s250_s0, %s250_s0, %s251_s7  }
  0x23   :  { %242 = dma.done.wait [#allocation3], 128  }
  0x24   :  { %243 = vsyncadd [#allocation3], 4294967168 }
  0x25   :  { %244 = dma.done.wait [#allocation6], 512  }
  0x26   :  { %245 = vsyncadd [#allocation6], 4294966784  ;;  %v252_v0 = vmov 0.0|0.0   ;;  %vm253_vm0 = vmmov 0   ;;  %v254_v1 = vmov 0.0   ;;  %v42_v2 = vld [vmem:[#allocation5] sm:$0xff] }
  0x27   :  { %162 = vmatprep.subr.bf16.mxu0 %v252_v0  ;;  %159 = vmatprep.mubr.msk.f32.mxu0 %vm253_vm0, %v254_v1  ;;  %v43_v3 = vld [vmem:[#allocation5 + $0x8] sm:$0xff]  ;;  %v44_v4 = vld [vmem:[#allocation5 + $0x10] sm:$0xff]  ;;  %v45_v6 = vld [vmem:[#allocation5 + $0x18] sm:$0xff]  ;;  %vm53_vm1 = vcmask 261120   ;;  %s255_s11 = smov [#allocation7]  }
  0x28   :  { %v163_v5 = vpack.c.bf16 %v43_v3, %v42_v2  ;;  %v166_v7 = vpack.c.bf16 %v45_v6, %v44_v4  ;;  %v41_v8 = vld [vmem:[#allocation2] sm:$0xff]  ;;  %s134_s12 = sshll.u32 %s255_s11, 4  ;;  %s135_s12 = int_to_ptr.vmem [resolvable:$true] %s134_s12 }
  0x29   :  { %v144_v9 = vld [vmem:[%s324_s2] ss:$0 sm:$0xff]  ;;  %s220_s13 = scalar_lea.vmem %s135_s12, 128  ;;  %p225_p3 = scmp.lt.s32.totalorder %s135_s12, %s135_s12 }
  0x2a   :  { %164 = vmatpush3.bf16.msra.mxu0 %v163_v5  ;;  %p221_p2 = scmp.ne.s32.totalorder %s135_s12, %s220_s13  ;;  %p226_p4 = scmp.lt.s32.totalorder %s220_s13, %s220_s13 }
  0x2b   :  { %165 = vmatprep.subr.bf16.mxu0 %v252_v0 }
  0x2c   :  { %p227_p5 = por %p226_p4, %p225_p3 }
  0x2e   :  { %167 = vmatpush3.bf16.msra.mxu0 %v166_v7  ;;  %p228_p6 = pnand %p227_p5, %p221_p2 }
  0x31   :  { %160 = vmatmul.mubr.msk.f32.vlgmr.msra.gmra.mrb[0].mxu0 %vm53_vm1, %v41_v8 }
 0x104   :  { %v123_v10 = vpop.f32.mrb[0].mxu0 }
 0x105   :  { %v124_v11 = vadd.f32 %v144_v9, %v123_v10  ;;  %v161_v12 = vpop.f32.mrb[1].mxu0 }
 0x107   :  { %127 = vst [vmem:[#allocation7] sm:$0xff] %v124_v11 }
 0x108   :  { %231 = shalt.err (!%p228_p6)
}
 0x109   :  { %s232_s16 = scalar_lea.hbm %s325_s3, 128 }
 0x10a   :  { %p233_p7 = scmp.ne.s32.totalorder %s325_s3, %s232_s16  ;;  %p236_p8 = scmp.lt.u32.totalorder %s232_s16, %s325_s3 }
 0x10c   :  { %p238_p9 = pnand %p236_p8, %p233_p7 }
 0x10e   :  { %241 = shalt.err (!%p238_p9)
}
 0x10f   :  { %137 = dma.vmem_to_hbm [thread:$0]  %s135_s12, 128, %s325_s3, [#allocation4]  }
 0x110   :  { %246 = dma.done.wait [#allocation4], 128  }
 0x111   :  { %247 = vsyncadd [#allocation4], 4294967168 }
 0x112   :  { %141 = vsyncpa [#allocation3], 1 }
 0x113   :  { %142 = vsyncpa [#allocation6], 1 }
 0x114   :  { %143 = vsyncpa [#allocation4], 1 }

</bundles_post_ra>
